<compile_context>
chip_gen: v7x
topology: tpu7x:2x2x1
jax: 0.10.0
libtpu: 0.0.40
codegen_flags: <defaults>
</compile_context>

<pallas_src>
import math

import jax
import jax.numpy as jnp
from jax.experimental import pallas as pl
from jax.experimental.pallas import tpu as pltpu

NEG_INF = -1e30


# ---------------------------------------------------------------------------
# Kernel 1: fused Q/K/V projection (one wide matmul against stacked weights).
# ---------------------------------------------------------------------------
def _make_qkv_kernel(hidden, compute_dtype):
    H = hidden

    def kernel(x_ref, wqkvT_ref, q_ref, k_ref, v_ref):
        # (TR, F) @ (F, 3H) -> (TR, 3H), f32 accumulation on the MXU.
        qkv = jnp.dot(x_ref[...], wqkvT_ref[...],
                      preferred_element_type=jnp.float32)
        q_ref[...] = qkv[:, 0 * H:1 * H].astype(q_ref.dtype)
        k_ref[...] = qkv[:, 1 * H:2 * H].astype(k_ref.dtype)
        v_ref[...] = qkv[:, 2 * H:3 * H].astype(v_ref.dtype)

    return kernel


# ---------------------------------------------------------------------------
# Kernel 2: multi-head attention + output projection over one query tile.
# ---------------------------------------------------------------------------
def _make_attn_kernel(*, num_head, d_k, seq_real, seq_pad, compute_dtype):
    need_mask = seq_pad != seq_real

    def kernel(q_ref, k_ref, v_ref, wfcT_ref, out_ref, y_scratch):
        # Hoisted key-padding additive bias (computed once, added per head).
        if need_mask:
            key_ids = jax.lax.broadcasted_iota(jnp.int32, (1, seq_pad), 1)
            bias = jnp.where(key_ids < seq_real,
                             jnp.float32(0.0), jnp.float32(NEG_INF))

        # Per-head scaled-dot-product attention (static unrolled loop).
        # NOTE: for the real model (H=1024, num_head=8) d_k=128, so every
        # column slice below is lane-aligned and the QK^T contraction depth
        # fills the MXU; for tiny test shapes it is merely correct.
        for h in range(num_head):
            lo, hi = h * d_k, (h + 1) * d_k
            q_h = q_ref[:, lo:hi]                      # (TQ, dk)  (pre-scaled)
            k_h = k_ref[:, lo:hi]                      # (S_pad, dk)
            v_h = v_ref[:, lo:hi]                      # (S_pad, dk)

            # scores = (Q/sqrt(dk)) K^T  — contract the d_k axis of both.
            s = jax.lax.dot_general(
                q_h, k_h, (((1,), (1,)), ((), ())),
                preferred_element_type=jnp.float32)    # (TQ, S_pad) f32
            if need_mask:
                s = s + bias

            # Lane-axis softmax in f32 (exact reciprocal: denom >= 1, cheap,
            # off the MXU critical path).
            m = jnp.max(s, axis=-1, keepdims=True)
            e = jnp.exp(s - m)
            denom = jnp.sum(e, axis=-1, keepdims=True)
            p = e * pl.reciprocal(denom, approx=False)

            y_h = jnp.dot(p.astype(compute_dtype), v_h,
                          preferred_element_type=jnp.float32)     # (TQ, dk)
            # Write straight into the concat scratch (bounds live ranges,
            # no jnp.concatenate relayout).
            y_scratch[:, lo:hi] = y_h.astype(compute_dtype)

        # Output projection: one K=H matmul, lane-dense (TQ, F) store.
        out = jnp.dot(y_scratch[...], wfcT_ref[...],
                      preferred_element_type=jnp.float32)
        out_ref[...] = out.astype(out_ref.dtype)

    return kernel


# ---------------------------------------------------------------------------
# Wrapper.
# ---------------------------------------------------------------------------
def attention_extractor(x, wq, wk, wv, wfc, num_head, *, tq=256,
                        compute_dtype=jnp.bfloat16,
                        vmem_limit_bytes=48 * 1024 * 1024):
    """Fused multi-head self-attention forward (eval mode).

    x   : (1, S, F)               input sequence (module is batch=1 by design)
    wq  : (H, F)  wk: (H, F)  wv: (H, F)   -- nn.Linear weights (out, in), no bias
    wfc : (F, H)                           -- output projection weight, no bias
    returns (1, S, F)
    """
    assert x.ndim == 3 and x.shape[0] == 1, "module assumes batch size 1"
    _, S, F = x.shape
    H = wq.shape[0]
    assert H % num_head == 0
    d_k = H // num_head
    scale = 1.0 / math.sqrt(d_k)

    # ---- query/row tile size ------------------------------------------------
    # Multiple of 8 sublanes; default 256 fills the 256-wide MXU on v6e/v7x and
    # amortizes per-step overhead on v5e.  Force >=2 tiles when the sequence
    # allows it so v7x's two TensorCores both get work on the "parallel" axis.
    S8 = ((S + 7) // 8) * 8
    TQ = min(((tq + 7) // 8) * 8, S8)
    if S8 // TQ < 2 and S8 >= 16:
        TQ = ((pl.cdiv(S8, 2) + 7) // 8) * 8
    n_tiles = pl.cdiv(S8, TQ)
    S_pad = n_tiles * TQ

    x2 = x[0]
    if S_pad != S:
        x2 = jnp.pad(x2, ((0, S_pad - S), (0, 0)))
    x2 = x2.astype(compute_dtype)

    # ---- weights: stack Q/K/V into one (F, 3H), fold the scale into Wq ------
    wqkvT = jnp.concatenate(
        [(wq * scale).T, wk.T, wv.T], axis=1).astype(compute_dtype)   # (F, 3H)
    wfcT = wfc.T.astype(compute_dtype)                                 # (H, F)

    cparams = pltpu.CompilerParams(
        dimension_semantics=("parallel",),
        vmem_limit_bytes=vmem_limit_bytes,
    )

    # ---- pass 1: Q/K/V projections, computed exactly once -------------------
    qkv_kernel = _make_qkv_kernel(H, compute_dtype)
    q_all, k_all, v_all = pl.pallas_call(
        qkv_kernel,
        out_shape=(
            jax.ShapeDtypeStruct((S_pad, H), compute_dtype),
            jax.ShapeDtypeStruct((S_pad, H), compute_dtype),
            jax.ShapeDtypeStruct((S_pad, H), compute_dtype),
        ),
        grid_spec=pltpu.PrefetchScalarGridSpec(
            num_scalar_prefetch=0,
            grid=(n_tiles,),
            in_specs=[
                pl.BlockSpec((TQ, F), lambda i: (i, 0)),      # x row tile
                pl.BlockSpec((F, 3 * H), lambda i: (0, 0),    # stacked weights
                             pipeline_mode=pl.Buffered(1)),
            ],
            out_specs=[
                pl.BlockSpec((TQ, H), lambda i: (i, 0)),
                pl.BlockSpec((TQ, H), lambda i: (i, 0)),
                pl.BlockSpec((TQ, H), lambda i: (i, 0)),
            ],
        ),
        compiler_params=cparams,
    )(x2, wqkvT)

    # ---- pass 2: attention + output projection over query tiles -------------
    attn_kernel = _make_attn_kernel(
        num_head=num_head, d_k=d_k, seq_real=S, seq_pad=S_pad,
        compute_dtype=compute_dtype)

    out = pl.pallas_call(
        attn_kernel,
        out_shape=jax.ShapeDtypeStruct((S_pad, F), x.dtype),
        grid_spec=pltpu.PrefetchScalarGridSpec(
            num_scalar_prefetch=0,
            grid=(n_tiles,),
            in_specs=[
                pl.BlockSpec((TQ, H), lambda i: (i, 0)),        # Q row tile
                pl.BlockSpec((S_pad, H), lambda i: (0, 0),      # full K
                             pipeline_mode=pl.Buffered(1)),
                pl.BlockSpec((S_pad, H), lambda i: (0, 0),      # full V
                             pipeline_mode=pl.Buffered(1)),
                pl.BlockSpec((H, F), lambda i: (0, 0),          # Wfc^T
                             pipeline_mode=pl.Buffered(1)),
            ],
            out_specs=pl.BlockSpec((TQ, F), lambda i: (i, 0)),
            scratch_shapes=[pltpu.VMEM((TQ, H), compute_dtype)],
        ),
        compiler_params=cparams,
    )(q_all, k_all, v_all, wfcT)

    return out[:S][None]


# ---------------------------------------------------------------------------
# Pure-JAX reference (mirrors the PyTorch forward in eval mode).
# ---------------------------------------------------------------------------
def attention_extractor_ref(x, wq, wk, wv, wfc, num_head):
    _, S, F = x.shape
    H = wq.shape[0]
    d_k = H // num_head

    def split_heads(t):          # (S, H) -> (num_head, S, d_k)
        return t.reshape(S, num_head, d_k).transpose(1, 0, 2)

    q = split_heads(x[0] @ wq.T)
    k = split_heads(x[0] @ wk.T)
    v = split_heads(x[0] @ wv.T)
    attn = jax.nn.softmax(
        jnp.einsum('hqd,hkd->hqk', q, k) / math.sqrt(d_k), axis=-1)
    y = jnp.einsum('hqk,hkd->hqd', attn, v)          # (num_head, S, d_k)
    y = y.transpose(1, 0, 2).reshape(1, S, H)
    return y @ wfc.T


if __name__ == "__main__":
    def run_case(S, F, H, num_head):
        key = jax.random.PRNGKey(0)
        kx, k1, k2, k3, k4 = jax.random.split(key, 5)
        x = jax.random.normal(kx, (1, S, F), dtype=jnp.float32)

        # nn.Linear default init bounds (uniform(-1/sqrt(in), 1/sqrt(in)))
        b_in = 1.0 / math.sqrt(F)
        b_fc = 1.0 / math.sqrt(H)
        wq = jax.random.uniform(k1, (H, F), minval=-b_in, maxval=b_in,
                                dtype=jnp.float32)
        wk = jax.random.uniform(k2, (H, F), minval=-b_in, maxval=b_in,
                                dtype=jnp.float32)
        wv = jax.random.uniform(k3, (H, F), minval=-b_in, maxval=b_in,
                                dtype=jnp.float32)
        wfc = jax.random.uniform(k4, (F, H), minval=-b_fc, maxval=b_fc,
                                 dtype=jnp.float32)

        out = attention_extractor(x, wq, wk, wv, wfc, num_head)
        out = jax.block_until_ready(out)
        ref = attention_extractor_ref(x, wq, wk, wv, wfc, num_head)

        assert out.shape == (1, S, F)
        err = float(jnp.max(jnp.abs(out - ref)))
        # tolerance covers bf16 MXU operands (f32 accumulation)
        assert jnp.allclose(out, ref, rtol=5e-2, atol=5e-2), err
        return err

    # small shapes consistent with the module (batch fixed to 1 by the module)
    run_case(S=16, F=32, H=32, num_head=4)      # 2 tiles, no key padding
    run_case(S=200, F=64, H=64, num_head=8)     # multi-tile grid + key masking

    print("KERNEL_OK")
</pallas_src>

<mosaic_0001>
module attributes {stable_mosaic.version = 11 : i64} {
  func.func @kernel(%arg0: i32, %arg1: memref<8x32xbf16, #tpu.memory_space<vmem>>, %arg2: memref<32x96xbf16, #tpu.memory_space<vmem>>, %arg3: memref<8x32xbf16, #tpu.memory_space<vmem>>, %arg4: memref<8x32xbf16, #tpu.memory_space<vmem>>, %arg5: memref<8x32xbf16, #tpu.memory_space<vmem>>) attributes {dimension_semantics = [#tpu.dimension_semantics<parallel>], iteration_bounds = array<i64: 2>, scalar_prefetch = 0 : i64, scratch_operands = 0 : i64, tpu.core_type = #tpu.core_type<tc>, window_params = [{transform_indices = @transform_0, window_bounds = array<i64: 8, 32>}, {pipeline_mode = #tpu.pipeline_mode<synchronous>, transform_indices = @transform_1, window_bounds = array<i64: 32, 96>}, {transform_indices = @transform_2, window_bounds = array<i64: 8, 32>}, {transform_indices = @transform_3, window_bounds = array<i64: 8, 32>}, {transform_indices = @transform_4, window_bounds = array<i64: 8, 32>}]} {
    %c0 = arith.constant 0 : index
    %c0_0 = arith.constant 0 : index
    %0 = vector.load %arg1[%c0, %c0_0] : memref<8x32xbf16, #tpu.memory_space<vmem>>, vector<8x32xbf16>
    %c0_1 = arith.constant 0 : index
    %c0_2 = arith.constant 0 : index
    %1 = vector.load %arg2[%c0_1, %c0_2] : memref<32x96xbf16, #tpu.memory_space<vmem>>, vector<32x96xbf16>
    %cst = arith.constant dense<0.000000e+00> : vector<8x96xf32>
    %2 = tpu.matmul %0, %1, %cst {dimension_numbers = #tpu.dot_dimension_numbers<[1], [0], [0], [1], [0, 0, 1, 1], [], []>} : vector<8x32xbf16>, vector<32x96xbf16>, vector<8x96xf32> -> vector<8x96xf32>
    %3 = vector.extract_strided_slice %2 {offsets = [0, 0], sizes = [8, 32], strides = [1, 1]} : vector<8x96xf32> to vector<8x32xf32>
    %4 = arith.truncf %3 : vector<8x32xf32> to vector<8x32xbf16>
    %c0_3 = arith.constant 0 : index
    %c0_4 = arith.constant 0 : index
    %5 = vector.load %arg3[%c0_3, %c0_4] : memref<8x32xbf16, #tpu.memory_space<vmem>>, vector<8x32xbf16>
    tpu.vector_store %arg3[%c0_3, %c0_4], %4 {strides = array<i32>} : memref<8x32xbf16, #tpu.memory_space<vmem>>, vector<8x32xbf16>,
    %6 = vector.extract_strided_slice %2 {offsets = [0, 32], sizes = [8, 32], strides = [1, 1]} : vector<8x96xf32> to vector<8x32xf32>
    %7 = arith.truncf %6 : vector<8x32xf32> to vector<8x32xbf16>
    %c0_5 = arith.constant 0 : index
    %c0_6 = arith.constant 0 : index
    %8 = vector.load %arg4[%c0_5, %c0_6] : memref<8x32xbf16, #tpu.memory_space<vmem>>, vector<8x32xbf16>
    tpu.vector_store %arg4[%c0_5, %c0_6], %7 {strides = array<i32>} : memref<8x32xbf16, #tpu.memory_space<vmem>>, vector<8x32xbf16>,
    %9 = vector.extract_strided_slice %2 {offsets = [0, 64], sizes = [8, 32], strides = [1, 1]} : vector<8x96xf32> to vector<8x32xf32>
    %10 = arith.truncf %9 : vector<8x32xf32> to vector<8x32xbf16>
    %c0_7 = arith.constant 0 : index
    %c0_8 = arith.constant 0 : index
    %11 = vector.load %arg5[%c0_7, %c0_8] : memref<8x32xbf16, #tpu.memory_space<vmem>>, vector<8x32xbf16>
    tpu.vector_store %arg5[%c0_7, %c0_8], %10 {strides = array<i32>} : memref<8x32xbf16, #tpu.memory_space<vmem>>, vector<8x32xbf16>,
    return
  }
  func.func @transform_0(%arg0: i32) -> (i32, i32) {
    %c0_i32 = arith.constant 0 : i32
    %c0_i32_0 = arith.constant 0 : i32
    return %arg0, %c0_i32 : i32, i32
  }
  func.func @transform_1(%arg0: i32) -> (i32, i32) {
    %c0_i32 = arith.constant 0 : i32
    %c0_i32_0 = arith.constant 0 : i32
    %c0_i32_1 = arith.constant 0 : i32
    return %c0_i32, %c0_i32_0 : i32, i32
  }
  func.func @transform_2(%arg0: i32) -> (i32, i32) {
    %c0_i32 = arith.constant 0 : i32
    %c0_i32_0 = arith.constant 0 : i32
    return %arg0, %c0_i32 : i32, i32
  }
  func.func @transform_3(%arg0: i32) -> (i32, i32) {
    %c0_i32 = arith.constant 0 : i32
    %c0_i32_0 = arith.constant 0 : i32
    return %arg0, %c0_i32 : i32, i32
  }
  func.func @transform_4(%arg0: i32) -> (i32, i32) {
    %c0_i32 = arith.constant 0 : i32
    %c0_i32_0 = arith.constant 0 : i32
    return %arg0, %c0_i32 : i32, i32
  }
}

</mosaic_0001>

<bundles_post_ra>
// kernel: tpu_custom_call.1
= control target key start
LH: loop header
LB: loop body
LE: loop exit
PB: predicated region body
PF: predicated region fallthrough
CT: control target
= control target key end

     0   :  { %10 = vsyncpa [#allocation3], 0  ;;  %s1132_s0 = inlined_call_operand.hbm [shape: bf16[16,32], index: 0, kind: input, shape index: {}]   ;;  %s1133_s1 = inlined_call_operand.hbm [shape: bf16[32,96], index: 1, kind: input, shape index: {}]   ;;  %s1134_s2 = inlined_call_operand.hbm [shape: bf16[16,32], index: 2, kind: output, shape index: {0}]   ;;  %s1135_s3 = inlined_call_operand.hbm [shape: bf16[16,32], index: 3, kind: output, shape index: {1}]   ;;  %s1136_s4 = inlined_call_operand.hbm [shape: bf16[16,32], index: 4, kind: output, shape index: {2}]  }
   0x1   :  { %12 = vsyncpa [#allocation3 + $0x1], 0 }
   0x2   :  { %13 = vsyncpa [#allocation6], 0 }
   0x3   :  { %14 = vsyncpa [#allocation4], 0 }
   0x4   :  { %16 = vsyncpa [#allocation4 + $0x1], 0 }
   0x5   :  { %17 = vsyncpa [#allocation9], 0 }
   0x6   :  { %19 = vsyncpa [#allocation9 + $0x1], 0  ;;  %s850_s15 = smov 0   ;;  %s852_s16 = smov 0  }
   0x7   :  { %s854_s17 = smov 0   ;;  %s856_s18 = smov 0  }
   0x8 LB: > { %s871_s19 = sadd.s32 4294967295, %s812_s18   ;;  %s513_s20 = sadd.s32 4294967294, %s812_s18   ;;  %s812_s18 = sphi %s856_s18, %s1156_s18   ;;  %s808_s17 = sphi %s854_s17, %s1155_s17   ;;  %s804_s16 = sphi %s852_s16, %s1154_s16   ;;  %s800_s15 = sphi %s850_s15, %s1153_s15  }
   0x9   : > { %p45_p0 = scmp.ne.s32.totalorder %s804_s16, %s800_s15  ;;  %p1137_p1 = scmp.eq.s32.totalorder %s871_s19, 0 }
   0xa   : > { %p96_p3 = scmp.eq.s32.totalorder %s513_s20, 1  ;;  %p514_p5 = scmp.ge.s32.totalorder %s812_s18, 1 }
   0xb   : > { %p882_p4 = por %p1137_p1, %p45_p0  ;;  %p155_p7 = scmp.lt.s32.totalorder %s812_s18, 3 }
   0xc   : > { %p887_p6 = por %p96_p3, %p45_p0  ;;  %s814_s24 = smov [#allocation5]  }
   0xd   : > { %s1140_s21 = scalar_select %p882_p4, 1, 0 }
   0xe   : > { %s1141_s22 = scalar_select %p887_p6, 1, 0 }
   0xf   : > { %p892_p8 = pnand %p514_p5, %p155_p7  ;;  %s167_s25 = sshll.u32 %s814_s24, 4  ;;  %s896_s25 = int_to_ptr.vmem [resolvable:$true] %s167_s25 }
  0x10   : > { %s908_s27 = sadd.s32 1, %s812_s18   ;;  %s32_s28 = sadd.s32 1, %s808_s17 }
  0x11   : > { %s1142_s23 = scalar_select %p892_p8, 1, 0 }
  0x12   : > { %p561_p9 = pneg %p892_p8  ;;  %s29_s29 = ssub.s32 %s812_s18, %s908_s27 }
  0x13   : > { %s624_s6 = scalar_lea.hbm %s1133_s1, 256 }
  0x14   : > { %p903_p11 = pnand %p561_p9, %p1137_p1  ;;  %p625_p12 = scmp.ne.s32.totalorder %s1133_s1, %s624_s6 }
  0x15   : > { %p631_p5 = scmp.lt.u32.totalorder %s624_s6, %s1133_s1 }
  0x16   : > { %p626_p13 = pneg %p903_p11 }
  0x18   : > { %p627_p0 = pnand %p626_p13, %p625_p12 }
  0x1a   : > { %p628_p3 = pneg %p627_p0 }
  0x1c   : > { %p633_p7 = pnand %p631_p5, %p628_p3 }
  0x1e   : > { %636 = shalt.err (!%p633_p7)
}
  0x1f   : > { %s637_s11 = scalar_lea.vmem %s896_s25, 256  ;;  %p645_p2 = scmp.lt.s32.totalorder %s896_s25, %s896_s25 }
  0x20   : > { %p638_p9 = scmp.ne.s32.totalorder %s896_s25, %s637_s11  ;;  %p646_p6 = scmp.lt.s32.totalorder %s637_s11, %s637_s11 }
  0x22   : > { %p640_p10 = pnand %p638_p9, %p626_p13  ;;  %p647_p4 = por %p646_p6, %p645_p2 }
  0x24   : > { %p641_p1 = pneg %p640_p10 }
  0x26   : > { %p648_p8 = pnand %p647_p4, %p641_p1 }
  0x28   : > { %651 = shalt.err (!%p648_p8)
}
  0x29   : > { %s815_s12 = smov 64   ;;  %s816_s13 = smov 4  }
  0x2a   : > { %564 = dma.hbm_to_vmem [thread:$0]  (!%p903_p11), %s1133_s1, 256, %s896_s25, [#allocation6], %s815_s12, %s815_s12, %s816_s13  }
  0x2b   : > { %p30_p2 = scmp.eq.s32.totalorder %s29_s29, 0  ;;  %p39_p1 = scmp.ne.s32.totalorder %s808_s17, %s804_s16 }
  0x2c   : > { %p40_p4 = scmp.eq.s32.totalorder %s812_s18, 0  ;;  %p580_p6 = scmp.lt.s32.totalorder %s812_s18, 2 }
  0x2d   : > { %s939_s30 = scalar_select %p30_p2, %s808_s17, %s32_s28  }
  0x2e   : > { %p41_p8 = por %p40_p4, %p39_p1  ;;  %p1144_p10 = scmp.eq.s32.totalorder %s871_s19, 1 }
  0x2f   : > { %s181_s6 = sand.u32 1, %s808_s17   ;;  %s518_s7 = sshll.u32 %s812_s18, 6 }
  0x30   : > { %p943_p12 = por %p1144_p10, %p39_p1  ;;  %s517_s8 = sshll.u32 %s181_s6, 2 }
  0x31   : > { %s952_s10 = scalar_lea.hbm %s1132_s0, %s518_s7  ;;  %s185_s25 = scalar_lea.vmem [#allocation2], %s517_s8 }
  0x32   : > { %s192_s28 = sshll.u32 %s185_s25, 4  ;;  %p954_p11 = pnand %p580_p6, %p41_p8  ;;  %s958_s28 = int_to_ptr.vmem [resolvable:$true] %s192_s28 }
  0x33   : > { %s182_s11 = scalar_lea.sflag [#allocation3], %s181_s6  ;;  %s652_s12 = scalar_lea.hbm %s952_s10, 64 }
  0x34   : > { %p653_p13 = scmp.ne.s32.totalorder %s952_s10, %s652_s12  ;;  %p654_p0 = pneg %p954_p11 }
  0x35   : > { %s657_s24 = scalar_lea.hbm %s1132_s0, 128  ;;  %p658_p7 = scmp.lt.u32.totalorder %s952_s10, %s1132_s0 }
  0x36   : > { %p655_p3 = pnand %p654_p0, %p653_p13  ;;  %p659_p9 = scmp.lt.u32.totalorder %s657_s24, %s652_s12 }
  0x37   : > { %p661_p1 = scmp.lt.u32.totalorder %s652_s12, %s952_s10 }
  0x38   : > { %p656_p5 = pneg %p655_p3  ;;  %p660_p2 = por %p659_p9, %p658_p7 }
  0x3a   : > { %p662_p4 = por %p661_p1, %p660_p2 }
  0x3c   : > { %p663_p6 = pnand %p662_p4, %p656_p5 }
  0x3e   : > { %666 = shalt.err (!%p663_p6)
}
  0x3f   : > { %s667_s6 = scalar_lea.vmem %s958_s28, 64  ;;  %s817_s26 = smov [#allocation2]  }
  0x40   : > { %p668_p8 = scmp.ne.s32.totalorder %s958_s28, %s667_s6  ;;  %s672_s9 = sshll.u32 %s817_s26, 4  ;;  %s673_s9 = int_to_ptr.vmem [resolvable:$false] %s672_s9 }
  0x41   : > { %s674_s25 = scalar_lea.vmem %s673_s9, 128  ;;  %p675_p3 = scmp.lt.s32.totalorder %s958_s28, %s673_s9 }
  0x42   : > { %p670_p10 = pnand %p668_p8, %p654_p0  ;;  %p676_p7 = scmp.lt.s32.totalorder %s674_s25, %s667_s6 }
  0x44   : > { %p671_p13 = pneg %p670_p10  ;;  %p677_p9 = por %p676_p7, %p675_p3 }
  0x46   : > { %p678_p2 = pnand %p677_p9, %p671_p13 }
  0x48   : > { %681 = shalt.err (!%p678_p2)
}
  0x49   : > { %568 = dma.hbm_to_vmem [thread:$0]  (!%p954_p11), %s952_s10, 64, %s958_s28, %s182_s11  }
  0x4a   : > { %p1147_p5 = scmp.ne.s32.totalorder %s1142_s23, 0 }
  0x4b   : > { %s988_s12 = sand.u32 (!%p1147_p5), 1, %s804_s16   ;;  %p1148_p0 = scmp.ne.s32.totalorder (!%p1147_p5), %s1140_s21, 0 }
  0x4c   : > { %201 = sbr.rel (%p1147_p5) target bundleno = 462 (0x1ce), region = 28  ;;  %s991_s13 = sshll.u32 (!%p1147_p5), %s988_s12, 2 }
  0x4d   : > { %s204_s14 = scalar_lea.sflag (!%p1147_p5), [#allocation3], %s988_s12  ;;  %s207_s24 = scalar_lea.vmem (!%p1147_p5), [#allocation2], %s991_s13 }
  0x53   : > { %783 = dma.done.wait (%p1148_p0), %s204_s14, 64  }
  0x54   : > { %785 = vsyncadd (%p1148_p0), %s204_s14, 4294967232  ;;  %p1149_p11 = scmp.eq.s32.totalorder %s871_s19, 0 }
  0x56   : > { %787 = dma.done.wait (%p1149_p11), [#allocation6], 256   ;;  %p1150_p1 = pmov %p1149_p11 }
  0x57   : > { %v818_v0 = vmov 0.0   ;;  %vm819_vm0 = vmmov 0   ;;  %v622_v1 = vld [vmem:[#allocation5] sm:$0xff]   ;;  %v623_v2 = vld [vmem:[#allocation5 + $0x8] sm:$0xff]   ;;  %v247_v3 = vld [vmem:[%s207_s24] sm:$0xf] }
  0x58   : > { %789 = vsyncadd (%p1150_p1), [#allocation6], 4294967040  ;;  %541 = vmatprep.subr.bf16.mxu0 %v818_v0  ;;  %545 = vmatprep.mubr.msk.bf16.mxu0 %vm819_vm0, %v818_v0  ;;  %vm264_vm1 = vcmask 261120   ;;  %s1004_s21 = sshll.u32 %s871_s19, 6  ;;  %s231_s23 = scalar_lea.vmem [#allocation7], %s991_s13  ;;  %vm309_vm2 = vcmask 257024  }
  0x59   : > { %542 = vmatpush3.bf16.msra.mxu0 %v622_v1  ;;  %s346_s10 = sshll.u32 %s231_s23, 4  ;;  %s1011_s11 = scalar_lea.hbm %s1134_s2, %s1004_s21  ;;  %s1013_s10 = int_to_ptr.vmem [resolvable:$true] %s346_s10 }
  0x5a   : > { %543 = vmatprep.subr.bf16.mxu0 %v818_v0  ;;  %s820_s7 = smov 96   ;;  %s323_s8 = scalar_lea.sflag [#allocation4], %s988_s12 }
  0x5b   : > { %s682_s6 = scalar_lea.vmem %s1013_s10, 64  ;;  %s821_s26 = smov [#allocation7]  }
  0x5c   : > { %p683_p4 = scmp.ne.s32.totalorder %s1013_s10, %s682_s6  ;;  %s686_s9 = sshll.u32 %s821_s26, 4  ;;  %s687_s9 = int_to_ptr.vmem [resolvable:$false] %s686_s9 }
  0x5d   : > { %544 = vmatpush3.bf16.msra.mxu0 %v623_v2  ;;  %s688_s25 = scalar_lea.vmem %s687_s9, 128  ;;  %p689_p10 = scmp.lt.s32.totalorder %s1013_s10, %s687_s9 }
  0x5e   : > { %p684_p6 = pnand %p683_p4, %p943_p12  ;;  %p690_p13 = scmp.lt.s32.totalorder %s688_s25, %s682_s6 }
  0x60   : > { %546 = vmatmul.mubr.msk.bf16.vlgmr.msra.gmra.mrb[0].mxu0 %vm264_vm1, %v247_v3  ;;  %p685_p8 = pneg %p684_p6  ;;  %p691_p3 = por %p690_p13, %p689_p10 }
  0x62   : > { %p692_p7 = pnand %p691_p3, %p685_p8 }
 0x133   : > { %v302_v4 = vpop.f32.mrb[0].mxu0 }
 0x134   : > { %v308_v5 = vpack.c.bf16 %v302_v4, %v302_v4  ;;  %v547_v6 = vpop.f32.mrb[1].mxu0 }
 0x135   : > { %v305_v7 = vpop.f32.mrb[2].mxu0 }
 0x136   : > { %314 = vrot.lane.b32.xlu0 %v308_v5, %s820_s7  ;;  %v548_v8 = vpop.f32.mrb[3].mxu0  ;;  %310 = vst.msk [vmem:[%s231_s23] sm:$0xf] %vm309_vm2, %v308_v5 }
 0x137   : > { %695 = shalt.err (!%p692_p7)
}
 0x138   : > { %s696_s12 = scalar_lea.hbm %s1011_s11, 64  ;;  %s700_s23 = scalar_lea.hbm %s1134_s2, 128 }
 0x139   : > { %p697_p9 = scmp.ne.s32.totalorder %s1011_s11, %s696_s12  ;;  %p701_p0 = scmp.lt.u32.totalorder %s1011_s11, %s1134_s2 }
 0x13a   : > { %p702_p11 = scmp.lt.u32.totalorder %s700_s23, %s696_s12  ;;  %p704_p4 = scmp.lt.u32.totalorder %s696_s12, %s1011_s11 }
 0x13b   : > { %p698_p2 = pnand %p697_p9, %p943_p12 }
 0x13c   : > { %p703_p1 = por %p702_p11, %p701_p0 }
 0x13d   : > { %p699_p5 = pneg %p698_p2 }
 0x13e   : > { %p705_p6 = por %p704_p4, %p703_p1 }
 0x140   : > { %p706_p8 = pnand %p705_p6, %p699_p5 }
 0x142   : > { %709 = shalt.err (!%p706_p8)
}
 0x143   : > { %555 = dma.vmem_to_hbm [thread:$0]  (%p943_p12), %s1013_s10, 64, %s1011_s11, %s323_s8  }
 0x144   : > { %s822_s7 = smov 64   ;;  %s327_s6 = sand.u32 1, %s871_s19  }
 0x145   : > { %318 = vrot.lane.b32.xlu0 %v308_v5, %s822_s7  ;;  %s238_s26 = scalar_lea.vmem [#allocation8], %s991_s13  ;;  %s1044_s14 = scalar_lea.hbm %s1135_s3, %s1004_s21 }
 0x146   : > { %s359_s9 = sshll.u32 %s238_s26, 4  ;;  %s245_s24 = scalar_lea.vmem [#allocation10], %s991_s13  ;;  %s1046_s9 = int_to_ptr.vmem [resolvable:$true] %s359_s9 }
 0x147   : > { %s1051_s23 = sshll.u32 %s245_s24, 4  ;;  %s1054_s19 = scalar_lea.sflag [#allocation9], %s327_s6  ;;  %s1085_s23 = int_to_ptr.vmem [resolvable:$true] %s1051_s23 }
 0x148   : > { %s710_s10 = scalar_lea.vmem %s1046_s9, 64  ;;  %s823_s11 = smov [#allocation8]  }
 0x149   : > { %p711_p10 = scmp.ne.s32.totalorder %s1046_s9, %s710_s10  ;;  %s714_s8 = sshll.u32 %s823_s11, 4  ;;  %s715_s8 = int_to_ptr.vmem [resolvable:$false] %s714_s8 }
 0x14a   : > { %s716_s28 = scalar_lea.vmem %s715_s8, 128  ;;  %p717_p7 = scmp.lt.s32.totalorder %s1046_s9, %s715_s8 }
 0x14b   : > { %p712_p13 = pnand %p711_p10, %p943_p12  ;;  %p718_p9 = scmp.lt.s32.totalorder %s716_s28, %s710_s10 }
 0x14d   : > { %p713_p3 = pneg %p712_p13  ;;  %p719_p2 = por %p718_p9, %p717_p7 }
 0x14f   : > { %p720_p5 = pnand %p719_p2, %p713_p3 }
 0x1a8   : > { %v315_v9 = vpop.permute.xlu0 %314 }
 0x1a9   : > { %317 = vst.msk [vmem:[%s238_s26] sm:$0xf] %vm309_vm2, %v315_v9 }
 0x1aa   : > { %723 = shalt.err (!%p720_p5)
}
 0x1ab   : > { %s724_s29 = scalar_lea.hbm %s1044_s14, 64  ;;  %s728_s26 = scalar_lea.hbm %s1135_s3, 128 }
 0x1ac   : > { %p725_p0 = scmp.ne.s32.totalorder %s1044_s14, %s724_s29  ;;  %p729_p4 = scmp.lt.u32.totalorder %s1044_s14, %s1135_s3 }
 0x1ad   : > { %p730_p6 = scmp.lt.u32.totalorder %s728_s26, %s724_s29  ;;  %p732_p10 = scmp.lt.u32.totalorder %s724_s29, %s1044_s14 }
 0x1ae   : > { %p726_p11 = pnand %p725_p0, %p943_p12 }
 0x1af   : > { %p731_p8 = por %p730_p6, %p729_p4 }
 0x1b0   : > { %p727_p1 = pneg %p726_p11 }
 0x1b1   : > { %p733_p13 = por %p732_p10, %p731_p8 }
 0x1b3   : > { %p734_p3 = pnand %p733_p13, %p727_p1 }
 0x1b5   : > { %737 = shalt.err (!%p734_p3)
}
 0x1b6   : > { %556 = dma.vmem_to_hbm [thread:$0]  (%p943_p12), %s1046_s9, 64, %s1044_s14, %s1054_s19  }
 0x1b7   : > { %s1082_s8 = scalar_lea.hbm %s1136_s4, %s1004_s21  ;;  %v319_v10 = vpop.permute.xlu0 %318  ;;  %s738_s28 = scalar_lea.vmem %s1085_s23, 64 }
 0x1b8   : > { %321 = vst.msk [vmem:[%s245_s24] sm:$0xf] %vm309_vm2, %v319_v10  ;;  %p739_p7 = scmp.ne.s32.totalorder %s1085_s23, %s738_s28  ;;  %s824_s9 = smov [#allocation10]  }
 0x1b9   : > { %s742_s14 = sshll.u32 %s824_s9, 4  ;;  %s743_s14 = int_to_ptr.vmem [resolvable:$false] %s742_s14 }
 0x1ba   : > { %p740_p9 = pnand %p739_p7, %p943_p12  ;;  %s744_s29 = scalar_lea.vmem %s743_s14, 128 }
 0x1bb   : > { %p745_p5 = scmp.lt.s32.totalorder %s1085_s23, %s743_s14  ;;  %p746_p0 = scmp.lt.s32.totalorder %s744_s29, %s738_s28 }
 0x1bc   : > { %p741_p2 = pneg %p740_p9 }
 0x1bd   : > { %p747_p11 = por %p746_p0, %p745_p5 }
 0x1bf   : > { %p748_p1 = pnand %p747_p11, %p741_p2 }
 0x1c1   : > { %751 = shalt.err (!%p748_p1)
}
 0x1c2   : > { %s752_s13 = scalar_lea.hbm %s1082_s8, 64  ;;  %s756_s7 = scalar_lea.hbm %s1136_s4, 128 }
 0x1c3   : > { %p753_p4 = scmp.ne.s32.totalorder %s1082_s8, %s752_s13  ;;  %p757_p10 = scmp.lt.u32.totalorder %s1082_s8, %s1136_s4 }
 0x1c4   : > { %p758_p13 = scmp.lt.u32.totalorder %s756_s7, %s752_s13  ;;  %p760_p7 = scmp.lt.u32.totalorder %s752_s13, %s1082_s8 }
 0x1c5   : > { %p754_p6 = pnand %p753_p4, %p943_p12 }
 0x1c6   : > { %p759_p3 = por %p758_p13, %p757_p10 }
 0x1c7   : > { %p755_p8 = pneg %p754_p6 }
 0x1c8   : > { %p761_p9 = por %p760_p7, %p759_p3 }
 0x1ca   : > { %p762_p2 = pnand %p761_p9, %p755_p8 }
 0x1cc   : > { %765 = shalt.err (!%p762_p2)
}
 0x1cd   : > { %557 = dma.vmem_to_hbm [thread:$0]  (%p943_p12), %s1085_s23, 64, %s1082_s8, %s1054_s19  }
 0x1ce PF: > { %s384_s25 = sand.u32 1, %s800_s15   ;;  %p1151_p5 = scmp.ne.s32.totalorder %s1141_s22, 0 }
 0x1cf   : > { %p1152_p0 = scmp.ge.s32.totalorder %s812_s18, 2  ;;  %s385_s12 = scalar_lea.sflag [#allocation4], %s384_s25 }
 0x1d1   : > { %p570_p11 = pnand %p1152_p0, %p1151_p5 }
 0x1d3   : > { %791 = dma.done.wait (!%p570_p11), %s385_s12, 64  }
 0x1d4   : > { %793 = vsyncadd (!%p570_p11), %s385_s12, 4294967232  ;;  %s393_s10 = sand.u32 1, %s513_s20  }
 0x1d5   : > { %s394_s11 = scalar_lea.sflag [#allocation9], %s393_s10 }
 0x1d6   : > { %795 = dma.done.wait (!%p570_p11), %s394_s11, 128  }
 0x1d7   : > { %797 = vsyncadd (!%p570_p11), %s394_s11, 4294967168  ;;  %p22_p12 = scmp.ge.s32.totalorder %s908_s27, 4   ;;  %s1153_s15 = smov %s804_s16 }
 0x1d8   : > { %s1154_s16 = smov %s808_s17  ;;  %s1155_s17 = smov %s939_s30 }
 0x1d9   : > { %s1156_s18 = smov %s908_s27  ;;  %24 = sbr.rel (!%p22_p12) target bundleno = 8 (0x8), region = 109 }
 0x1e0   :  { %408 = vsyncpa [#allocation3], 1 }
 0x1e1   :  { %410 = vsyncpa [#allocation3 + $0x1], 1 }
 0x1e2   :  { %411 = vsyncpa [#allocation6], 1 }
 0x1e3   :  { %412 = vsyncpa [#allocation4], 1 }
 0x1e4   :  { %414 = vsyncpa [#allocation4 + $0x1], 1 }
 0x1e5   :  { %415 = vsyncpa [#allocation9], 1 }
 0x1e6   :  { %417 = vsyncpa [#allocation9 + $0x1], 1 }

</bundles_post_ra>
